<compile_context>
chip_gen: v5e
topology: v5e:2x2
jax: 0.10.0
libtpu: 0.0.40
codegen_flags: <defaults>
</compile_context>

<pallas_src>
import math
from functools import partial

import numpy as np
import jax
import jax.numpy as jnp
from jax.experimental import pallas as pl
from jax.experimental.pallas import tpu as pltpu


def _round_up(x, m):
    return ((x + m - 1) // m) * m


def _cdiv(a, b):
    return (a + b - 1) // b


def _largest_tile(total, requested, multiple):
    """Largest t <= requested with t % multiple == 0 and total % t == 0.
    Falls back to `total` (fully resident) only if no such tile exists."""
    if total % multiple != 0:
        return total
    t = min(requested, total)
    t -= t % multiple
    while t >= multiple and total % t != 0:
        t -= multiple
    return t if t >= multiple else total


def _device_profile():
    """Return (vmem_cap_bytes, num_tensorcores); conservative if chip unknown."""
    kind = ""
    try:
        kind = (jax.devices()[0].device_kind or "").lower()
    except Exception:
        pass
    if "v7" in kind:
        return 56 * 1024 * 1024, 2        # v7x: 64 MiB physical VMEM, 2 TCs
    if "v5" in kind or "v6" in kind:
        return 100 * 1024 * 1024, 1       # v5e/v5p/v6e: 128 MiB physical VMEM
    return 56 * 1024 * 1024, 1            # unknown: stay VMEM-safe


def _make_mlp_kernel(direct_acc: bool, approx_gelu: bool):
    def kernel(x_ref, w1_ref, b1_ref, w2_ref, b2_ref, o_ref, *scratch):
        # grid = (M_tiles, H_tiles); hidden axis (axis 1, last) is the reduction axis.
        # x_ref: (tm, E)  w1_ref: (E, th)  b1_ref: (1, th)
        # w2_ref: (th, E) b2_ref: (1, E)   o_ref: (tm, E)
        acc_ref = o_ref if direct_acc else scratch[0]
        h_idx = pl.program_id(1)

        @pl.when(h_idx == 0)
        def _():
            acc_ref[...] = jnp.zeros_like(acc_ref)

        # lin1 partial (this hidden tile only), f32 accumulation on the MXU.
        h = jnp.dot(x_ref[...], w1_ref[...], preferred_element_type=jnp.float32)
        h = h + b1_ref[...].astype(jnp.float32)

        if approx_gelu:
            # tanh approximation (EUP slot); cheaper but not bit-exact with torch.
            c = jnp.float32(0.7978845608028654)  # sqrt(2/pi)
            h = 0.5 * h * (1.0 + jnp.tanh(c * (h + 0.044715 * h * h * h)))
        else:
            # exact (erf) GELU in f32 — matches torch nn.GELU() default.
            h = 0.5 * h * (1.0 + jax.lax.erf(h * jnp.float32(0.7071067811865476)))

        # lin2 partial product over this hidden tile, accumulated in f32.
        acc_ref[...] += jnp.dot(
            h.astype(w2_ref.dtype), w2_ref[...], preferred_element_type=jnp.float32
        )

        @pl.when(h_idx == pl.num_programs(1) - 1)
        def _():
            o_ref[...] = (acc_ref[...] + b2_ref[...].astype(jnp.float32)).astype(o_ref.dtype)

    return kernel


@partial(jax.jit, static_argnames=("tm", "th", "compute_dtype", "approx_gelu"))
def mlp_block(x, w1, b1, w2, b2, *, tm=512, th=1024,
              compute_dtype=jnp.bfloat16, approx_gelu=False):
    """Fused MLP: GELU(x @ W1 + b1) @ W2 + b2, x: (B, N, E) -> (B, N, E)."""
    B, N, E = x.shape
    H = w1.shape[1]
    M = B * N
    out_dtype = x.dtype
    itemsize = np.dtype(compute_dtype).itemsize
    out_itemsize = np.dtype(out_dtype).itemsize
    direct_acc = np.dtype(out_dtype) == np.dtype(np.float32)

    vmem_cap, num_cores = _device_profile()

    # ---- hidden tile: largest divisor of H that is a multiple of 128 (<= th) ----
    th_eff = _largest_tile(H, th, 128)
    # TODO(synk): pad H when it is not a multiple of 128 at production sizes.

    # ---- token tile: balanced across M, multiple of 16/256, >=2 programs on v7x ----
    def _token_tiling(tm_req):
        n = max(1, _cdiv(M, max(16, tm_req)))
        if num_cores >= 2 and M > 512:
            n = max(n, 2)                    # keep both v7x TensorCores busy
        base = _cdiv(M, n)
        align = 256 if base >= 256 else 16
        t = _round_up(base, align)
        return t, n, t * n

    tm_eff, n_m, M_pad = _token_tiling(tm)

    # ---- shrink tiles if the double-buffered working set would exceed VMEM ----
    def _vmem_need(tm_, th_):
        b = 2 * tm_ * E * itemsize                              # x tiles
        b += 2 * 2 * E * th_ * itemsize                         # W1 + W2 tiles
        b += 2 * (_round_up(th_, 128) + _round_up(E, 128)) * 4  # biases
        b += 2 * tm_ * E * out_itemsize                         # output tiles
        if not direct_acc:
            b += tm_ * E * 4                                    # f32 accumulator
        return b

    budget = int(vmem_cap * 0.85)
    for _ in range(8):
        if _vmem_need(tm_eff, th_eff) <= budget:
            break
        if th_eff > 128 and H % 128 == 0:
            cand = _largest_tile(H, max(128, th_eff // 2), 128)
            if cand < th_eff:
                th_eff = cand
                continue
        if tm_eff > 32:
            tm_eff, n_m, M_pad = _token_tiling(max(16, tm_eff // 2))
            continue
        break

    # ---- pack operands: compute_dtype storage for x/W, f32 biases ----
    x2 = x.reshape(M, E).astype(compute_dtype)
    if M_pad != M:
        x2 = jnp.pad(x2, ((0, M_pad - M), (0, 0)))
    w1c = w1.astype(compute_dtype)
    w2c = w2.astype(compute_dtype)
    b1_2 = b1.reshape(1, H).astype(jnp.float32)
    b2_2 = b2.reshape(1, E).astype(jnp.float32)

    grid = (M_pad // tm_eff, H // th_eff)

    # Honest roofline: W1/W2 are re-streamed from HBM once per token tile.
    cost = pl.CostEstimate(
        flops=4 * M_pad * E * H,
        transcendentals=M_pad * H,
        bytes_accessed=(M_pad * E * itemsize
                        + grid[0] * 2 * E * H * itemsize
                        + (H + E) * 4
                        + M_pad * E * out_itemsize),
    )

    kernel = _make_mlp_kernel(direct_acc, approx_gelu)
    scratch_shapes = [] if direct_acc else [pltpu.VMEM((tm_eff, E), jnp.float32)]

    out = pl.pallas_call(
        kernel,
        out_shape=jax.ShapeDtypeStruct((M_pad, E), out_dtype),
        grid_spec=pltpu.PrefetchScalarGridSpec(
            num_scalar_prefetch=0,
            grid=grid,
            in_specs=[
                pl.BlockSpec((tm_eff, E), lambda i, h: (i, 0)),    # x token tile
                pl.BlockSpec((E, th_eff), lambda i, h: (0, h)),    # W1 column tile
                pl.BlockSpec((1, th_eff), lambda i, h: (0, h)),    # b1 tile
                pl.BlockSpec((th_eff, E), lambda i, h: (h, 0)),    # W2 row tile
                pl.BlockSpec((1, E), lambda i, h: (0, 0)),         # b2 (constant)
            ],
            out_specs=pl.BlockSpec((tm_eff, E), lambda i, h: (i, 0)),
            scratch_shapes=scratch_shapes,
        ),
        compiler_params=pltpu.CompilerParams(
            dimension_semantics=("parallel", "arbitrary"),
            vmem_limit_bytes=vmem_cap,
        ),
        cost_estimate=cost,
    )(x2, w1c, b1_2, w2c, b2_2)

    if M_pad != M:
        out = out[:M]
    return out.reshape(B, N, E)


def _reference(x, w1, b1, w2, b2):
    hp = jax.lax.Precision.HIGHEST
    h = jnp.dot(x, w1, precision=hp) + b1
    h = jax.nn.gelu(h, approximate=False)
    return jnp.dot(h, w2, precision=hp) + b2


if __name__ == "__main__":
    # Small shapes consistent with the module: embedding_dim=128, mlp_dim=256
    B, N, E, H = 2, 8, 128, 256

    key = jax.random.PRNGKey(0)
    kx, k1, k2, k3, k4 = jax.random.split(key, 5)

    x = jax.random.normal(kx, (B, N, E), dtype=jnp.float32)
    w1 = jax.random.uniform(k1, (E, H), jnp.float32, -1.0 / math.sqrt(E), 1.0 / math.sqrt(E))
    b1 = jax.random.uniform(k2, (H,), jnp.float32, -1.0 / math.sqrt(E), 1.0 / math.sqrt(E))
    w2 = jax.random.uniform(k3, (H, E), jnp.float32, -1.0 / math.sqrt(H), 1.0 / math.sqrt(H))
    b2 = jax.random.uniform(k4, (E,), jnp.float32, -1.0 / math.sqrt(H), 1.0 / math.sqrt(H))

    ref = _reference(x, w1, b1, w2, b2)

    # 1) f32 compute path (direct-accumulate-into-output): tight tolerance.
    out_f32 = jax.block_until_ready(mlp_block(x, w1, b1, w2, b2, compute_dtype=jnp.float32))
    assert out_f32.shape == (B, N, E)
    assert jnp.allclose(out_f32, ref, atol=5e-3, rtol=5e-3), "f32 path mismatch vs reference"

    # 2) default bf16-storage path (production config): looser tolerance expected.
    out_bf16 = jax.block_until_ready(mlp_block(x, w1, b1, w2, b2))
    assert out_bf16.shape == (B, N, E)
    assert jnp.allclose(out_bf16, ref, atol=5e-2, rtol=5e-2), "bf16 path mismatch vs reference"

    # 3) non-divisible token count exercises the padded-last-tile path.
    x_odd = jax.random.normal(kx, (2, 7, E), dtype=jnp.float32)
    out_odd = jax.block_until_ready(mlp_block(x_odd, w1, b1, w2, b2, compute_dtype=jnp.float32))
    assert jnp.allclose(out_odd, _reference(x_odd, w1, b1, w2, b2), atol=5e-3, rtol=5e-3)

    print("KERNEL_OK")
</pallas_src>

<mosaic_0001>
module attributes {stable_mosaic.version = 11 : i64} {
  func.func @kernel(%arg0: i32, %arg1: i32, %arg2: memref<16x128xf32, #tpu.memory_space<vmem>>, %arg3: memref<128x256xf32, #tpu.memory_space<vmem>>, %arg4: memref<1x256xf32, #tpu.memory_space<vmem>>, %arg5: memref<256x128xf32, #tpu.memory_space<vmem>>, %arg6: memref<1x128xf32, #tpu.memory_space<vmem>>, %arg7: memref<16x128xf32, #tpu.memory_space<vmem>>) attributes {dimension_semantics = [#tpu.dimension_semantics<parallel>, #tpu.dimension_semantics<arbitrary>], iteration_bounds = array<i64: 1, 1>, scalar_prefetch = 0 : i64, scratch_operands = 0 : i64, tpu.core_type = #tpu.core_type<tc>, window_params = [{transform_indices = @transform_0, window_bounds = array<i64: 16, 128>}, {transform_indices = @transform_1, window_bounds = array<i64: 128, 256>}, {transform_indices = @transform_2, window_bounds = array<i64: 1, 256>}, {transform_indices = @transform_3, window_bounds = array<i64: 256, 128>}, {pipeline_mode = #tpu.pipeline_mode<synchronous>, transform_indices = @transform_4, window_bounds = array<i64: 1, 128>}, {transform_indices = @transform_5, window_bounds = array<i64: 16, 128>}]} {
    %c0_i32 = arith.constant 0 : i32
    %0 = arith.cmpi eq, %arg1, %c0_i32 : i32
    %1 = arith.extui %0 : i1 to i32
    %c0_i32_0 = arith.constant 0 : i32
    %2 = arith.cmpi ne, %1, %c0_i32_0 : i32
    scf.if %2 {
      %cst_18 = arith.constant 0.000000e+00 : f32
      %25 = vector.broadcast %cst_18 : f32 to vector<16x128xf32>
      %c0_19 = arith.constant 0 : index
      %c0_20 = arith.constant 0 : index
      %26 = vector.load %arg7[%c0_19, %c0_20] : memref<16x128xf32, #tpu.memory_space<vmem>>, vector<16x128xf32>
      tpu.vector_store %arg7[%c0_19, %c0_20], %25 {strides = array<i32>} : memref<16x128xf32, #tpu.memory_space<vmem>>, vector<16x128xf32>,
    } else {
    }
    %c0 = arith.constant 0 : index
    %c0_1 = arith.constant 0 : index
    %3 = vector.load %arg2[%c0, %c0_1] : memref<16x128xf32, #tpu.memory_space<vmem>>, vector<16x128xf32>
    %c0_2 = arith.constant 0 : index
    %c0_3 = arith.constant 0 : index
    %4 = vector.load %arg3[%c0_2, %c0_3] : memref<128x256xf32, #tpu.memory_space<vmem>>, vector<128x256xf32>
    %cst = arith.constant dense<0.000000e+00> : vector<16x256xf32>
    %5 = tpu.matmul %3, %4, %cst {dimension_numbers = #tpu.dot_dimension_numbers<[1], [0], [0], [1], [0, 0, 1, 1], [], []>} : vector<16x128xf32>, vector<128x256xf32>, vector<16x256xf32> -> vector<16x256xf32>
    %c0_4 = arith.constant 0 : index
    %c0_5 = arith.constant 0 : index
    %6 = vector.load %arg4[%c0_4, %c0_5] : memref<1x256xf32, #tpu.memory_space<vmem>>, vector<1x256xf32>
    %7 = vector.broadcast %6 : vector<1x256xf32> to vector<16x256xf32>
    %8 = arith.addf %5, %7 : vector<16x256xf32>
    %cst_6 = arith.constant 5.000000e-01 : f32
    %9 = vector.broadcast %cst_6 : f32 to vector<16x256xf32>
    %10 = arith.mulf %9, %8 : vector<16x256xf32>
    %cst_7 = arith.constant 0.707106769 : f32
    %11 = vector.broadcast %cst_7 : f32 to vector<16x256xf32>
    %12 = arith.mulf %8, %11 : vector<16x256xf32>
    %13 = math.erf %12 : vector<16x256xf32>
    %cst_8 = arith.constant 1.000000e+00 : f32
    %14 = vector.broadcast %cst_8 : f32 to vector<16x256xf32>
    %15 = arith.addf %14, %13 : vector<16x256xf32>
    %16 = arith.mulf %10, %15 : vector<16x256xf32>
    %c0_9 = arith.constant 0 : index
    %c0_10 = arith.constant 0 : index
    %17 = vector.load %arg7[%c0_9, %c0_10] : memref<16x128xf32, #tpu.memory_space<vmem>>, vector<16x128xf32>
    %c0_11 = arith.constant 0 : index
    %c0_12 = arith.constant 0 : index
    %18 = vector.load %arg5[%c0_11, %c0_12] : memref<256x128xf32, #tpu.memory_space<vmem>>, vector<256x128xf32>
    %cst_13 = arith.constant dense<0.000000e+00> : vector<16x128xf32>
    %19 = tpu.matmul %16, %18, %cst_13 {dimension_numbers = #tpu.dot_dimension_numbers<[1], [0], [0], [1], [0, 0, 1, 1], [], []>} : vector<16x256xf32>, vector<256x128xf32>, vector<16x128xf32> -> vector<16x128xf32>
    %20 = arith.addf %17, %19 : vector<16x128xf32>
    %c0_14 = arith.constant 0 : index
    %c0_15 = arith.constant 0 : index
    %21 = vector.load %arg7[%c0_14, %c0_15] : memref<16x128xf32, #tpu.memory_space<vmem>>, vector<16x128xf32>
    tpu.vector_store %arg7[%c0_14, %c0_15], %20 {strides = array<i32>} : memref<16x128xf32, #tpu.memory_space<vmem>>, vector<16x128xf32>,
    %c0_i32_16 = arith.constant 0 : i32
    %22 = arith.cmpi eq, %arg1, %c0_i32_16 : i32
    %23 = arith.extui %22 : i1 to i32
    %c0_i32_17 = arith.constant 0 : i32
    %24 = arith.cmpi ne, %23, %c0_i32_17 : i32
    scf.if %24 {
      %c0_18 = arith.constant 0 : index
      %c0_19 = arith.constant 0 : index
      %25 = vector.load %arg7[%c0_18, %c0_19] : memref<16x128xf32, #tpu.memory_space<vmem>>, vector<16x128xf32>
      %c0_20 = arith.constant 0 : index
      %c0_21 = arith.constant 0 : index
      %26 = vector.load %arg6[%c0_20, %c0_21] : memref<1x128xf32, #tpu.memory_space<vmem>>, vector<1x128xf32>
      %27 = vector.broadcast %26 : vector<1x128xf32> to vector<16x128xf32>
      %28 = arith.addf %25, %27 : vector<16x128xf32>
      %c0_22 = arith.constant 0 : index
      %c0_23 = arith.constant 0 : index
      %29 = vector.load %arg7[%c0_22, %c0_23] : memref<16x128xf32, #tpu.memory_space<vmem>>, vector<16x128xf32>
      tpu.vector_store %arg7[%c0_22, %c0_23], %28 {strides = array<i32>} : memref<16x128xf32, #tpu.memory_space<vmem>>, vector<16x128xf32>,
    } else {
    }
    return
  }
  func.func @transform_0(%arg0: i32, %arg1: i32) -> (i32, i32) {
    %c0_i32 = arith.constant 0 : i32
    %c0_i32_0 = arith.constant 0 : i32
    return %arg0, %c0_i32 : i32, i32
  }
  func.func @transform_1(%arg0: i32, %arg1: i32) -> (i32, i32) {
    %c0_i32 = arith.constant 0 : i32
    %c0_i32_0 = arith.constant 0 : i32
    return %c0_i32, %arg1 : i32, i32
  }
  func.func @transform_2(%arg0: i32, %arg1: i32) -> (i32, i32) {
    %c0_i32 = arith.constant 0 : i32
    %c0_i32_0 = arith.constant 0 : i32
    return %c0_i32, %arg1 : i32, i32
  }
  func.func @transform_3(%arg0: i32, %arg1: i32) -> (i32, i32) {
    %c0_i32 = arith.constant 0 : i32
    %c0_i32_0 = arith.constant 0 : i32
    return %arg1, %c0_i32 : i32, i32
  }
  func.func @transform_4(%arg0: i32, %arg1: i32) -> (i32, i32) {
    %c0_i32 = arith.constant 0 : i32
    %c0_i32_0 = arith.constant 0 : i32
    %c0_i32_1 = arith.constant 0 : i32
    return %c0_i32, %c0_i32_0 : i32, i32
  }
  func.func @transform_5(%arg0: i32, %arg1: i32) -> (i32, i32) {
    %c0_i32 = arith.constant 0 : i32
    %c0_i32_0 = arith.constant 0 : i32
    return %arg0, %c0_i32 : i32, i32
  }
}

</mosaic_0001>

<bundles_post_ra>
// kernel: mlp_block.1
= control target key start
LH: loop header
LB: loop body
LE: loop exit
PB: predicated region body
PF: predicated region fallthrough
CT: control target
= control target key end

     0   :  { %10 = vsyncpa [#allocation3], 0  ;;  %s740_s0 = inlined_call_operand.hbm [shape: f32[16,128], index: 0, kind: input, shape index: {}]   ;;  %s741_s1 = inlined_call_operand.hbm [shape: f32[128,256], index: 1, kind: input, shape index: {}]   ;;  %s742_s2 = inlined_call_operand.vmem [shape: f32[1,256], index: 2, kind: input, shape index: {}]   ;;  %s743_s3 = inlined_call_operand.hbm [shape: f32[256,128], index: 3, kind: input, shape index: {}]   ;;  %s744_s4 = inlined_call_operand.vmem [shape: f32[1,128], index: 4, kind: input, shape index: {}]   ;;  %s745_s5 = inlined_call_operand.hbm [shape: f32[16,128], index: 5, kind: output, shape index: {}]  }
   0x1   :  { %11 = vsyncpa [#allocation6], 0  ;;  %s30_s20 = sshll.u32 %s741_s1, 4  ;;  %s31_s20 = int_to_ptr.hbm [resolvable:$true] %s30_s20 }
   0x2   :  { %12 = vsyncpa [#allocation4], 0  ;;  %s577_s21 = smov [#allocation5]   ;;  %s17_s25 = sshll.u32 %s740_s0, 4  ;;  %s18_s25 = int_to_ptr.hbm [resolvable:$true] %s17_s25 }
   0x3   :  { %s32_s22 = sshll.u32 %s577_s21, 4  ;;  %s578_s26 = smov 256   ;;  %s33_s22 = int_to_ptr.vmem [resolvable:$true] %s32_s22 }
   0x4   :  { %s579_s27 = smov 16   ;;  %s580_s28 = smov [#allocation2]  }
   0x5   :  { %38 = dma.hbm_to_vmem [thread:$0]  %s31_s20, 4096, %s33_s22, [#allocation6], %s578_s26, %s578_s26, %s579_s27  }
   0x6   :  { %s19_s29 = sshll.u32 %s580_s28, 4  ;;  %s581_s30 = smov 128   ;;  %s20_s29 = int_to_ptr.vmem [resolvable:$true] %s19_s29 }
   0x7   :  { %s582_s6 = smov 8   ;;  %s45_s8 = sshll.u32 %s743_s3, 4  ;;  %s46_s8 = int_to_ptr.hbm [resolvable:$true] %s45_s8 }
   0x8   :  { %25 = dma.hbm_to_vmem [thread:$0]  %s18_s25, 256, %s20_s29, [#allocation3], %s581_s30, %s581_s30, %s582_s6  }
   0x9   :  { %s583_s9 = smov [#allocation7]  }
   0xa   :  { %s47_s0 = sshll.u32 %s583_s9, 4  ;;  %s48_s0 = int_to_ptr.vmem [resolvable:$true] %s47_s0 }
   0xb   :  { %53 = dma.hbm_to_vmem [thread:$0]  %s46_s8, 4096, %s48_s0, [#allocation6], %s581_s30, %s581_s30, %s582_s6  }
   0xc   :  { %571 = dma.done.wait [#allocation3], 256  }
   0xd   :  { %572 = vsyncadd [#allocation3], 4294967040 }
   0xe   :  { %573 = dma.done.wait [#allocation6], 8192  }
   0xf   :  { %574 = vsyncadd [#allocation6], 4294959104  ;;  %v106_v0 = vld [vmem:[#allocation5 + $0xf0] sm:$0xff]  ;;  %v107_v1 = vld [vmem:[#allocation5 + $0xf8] sm:$0xff]  ;;  %s584_s12 = smov [#allocation8]   ;;  %s439_s16 = sshll.u32 %s745_s5, 4  ;;  %s440_s16 = int_to_ptr.hbm [resolvable:$true] %s439_s16 }
  0x10   :  { %v104_v2 = vld [vmem:[#allocation5 + $0xe0] sm:$0xff]  ;;  %114 = vmatpush.msra.mxu0 %v106_v0  ;;  %137 = vmatpush.msra.mxu1 %v107_v1  ;;  %v105_v3 = vld [vmem:[#allocation5 + $0xe8] sm:$0xff]  ;;  %v102_v4 = vld [vmem:[#allocation5 + $0xd0] sm:$0xff]  ;;  %s437_s13 = sshll.u32 %s584_s12, 4  ;;  %s438_s13 = int_to_ptr.vmem [resolvable:$true] %s437_s13 }
  0x11   :  { %v103_v5 = vld [vmem:[#allocation5 + $0xd8] sm:$0xff]  ;;  %v100_v6 = vld [vmem:[#allocation5 + $0xc0] sm:$0xff]  ;;  %v101_v7 = vld [vmem:[#allocation5 + $0xc8] sm:$0xff] }
  0x12   :  { %115 = vmatpush.msra.mxu0 %v104_v2  ;;  %138 = vmatpush.msra.mxu1 %v105_v3  ;;  %v98_v8 = vld [vmem:[#allocation5 + $0xb0] sm:$0xff]  ;;  %v99_v9 = vld [vmem:[#allocation5 + $0xb8] sm:$0xff]  ;;  %v96_v10 = vld [vmem:[#allocation5 + $0xa0] sm:$0xff] }
  0x13   :  { %v97_v11 = vld [vmem:[#allocation5 + $0xa8] sm:$0xff]  ;;  %v94_v12 = vld [vmem:[#allocation5 + $0x90] sm:$0xff]  ;;  %v95_v13 = vld [vmem:[#allocation5 + $0x98] sm:$0xff] }
  0x14   :  { %116 = vmatpush.msra.mxu0 %v102_v4  ;;  %139 = vmatpush.msra.mxu1 %v103_v5  ;;  %v92_v14 = vld [vmem:[#allocation5 + $0x80] sm:$0xff]  ;;  %v93_v15 = vld [vmem:[#allocation5 + $0x88] sm:$0xff]  ;;  %v90_v16 = vld [vmem:[#allocation5 + $0x70] sm:$0xff] }
  0x15   :  { %v91_v17 = vld [vmem:[#allocation5 + $0x78] sm:$0xff]  ;;  %v88_v18 = vld [vmem:[#allocation5 + $0x60] sm:$0xff]  ;;  %v89_v19 = vld [vmem:[#allocation5 + $0x68] sm:$0xff] }
  0x16   :  { %117 = vmatpush.msra.mxu0 %v100_v6  ;;  %140 = vmatpush.msra.mxu1 %v101_v7  ;;  %v86_v20 = vld [vmem:[#allocation5 + $0x50] sm:$0xff]  ;;  %v87_v21 = vld [vmem:[#allocation5 + $0x58] sm:$0xff]  ;;  %v84_v22 = vld [vmem:[#allocation5 + $0x40] sm:$0xff] }
  0x17   :  { %v85_v23 = vld [vmem:[#allocation5 + $0x48] sm:$0xff]  ;;  %v82_v24 = vld [vmem:[#allocation5 + $0x30] sm:$0xff]  ;;  %v83_v25 = vld [vmem:[#allocation5 + $0x38] sm:$0xff] }
  0x18   :  { %118 = vmatpush.msra.mxu0 %v98_v8  ;;  %141 = vmatpush.msra.mxu1 %v99_v9  ;;  %v80_v26 = vld [vmem:[#allocation5 + $0x20] sm:$0xff]  ;;  %v81_v27 = vld [vmem:[#allocation5 + $0x28] sm:$0xff]  ;;  %v78_v28 = vld [vmem:[#allocation5 + $0x10] sm:$0xff] }
  0x19   :  { %v79_v29 = vld [vmem:[#allocation5 + $0x18] sm:$0xff]  ;;  %v76_v30 = vld [vmem:[#allocation5] sm:$0xff]  ;;  %v77_v31 = vld [vmem:[#allocation5 + $0x8] sm:$0xff] }
  0x1a   :  { %119 = vmatpush.msra.mxu0 %v96_v10  ;;  %142 = vmatpush.msra.mxu1 %v97_v11  ;;  %v74_v32 = vld [vmem:[#allocation2] sm:$0xff]  ;;  %v75_v33 = vld [vmem:[#allocation2 + $0x8] sm:$0xff]  ;;  %v351_v39 = vld [vmem:[#allocation7 + $0x68] sm:$0xff] }
  0x1b   :  { %v353_v34 = vld [vmem:[#allocation7 + $0x78] sm:$0xff]  ;;  %v352_v36 = vld [vmem:[#allocation7 + $0x70] sm:$0xff]  ;;  %v367_v40 = vld [vmem:[#allocation7 + $0xe8] sm:$0xff] }
  0x1c   :  { %120 = vmatpush.msra.mxu0 %v94_v12  ;;  %143 = vmatpush.msra.mxu1 %v95_v13  ;;  %v369_v35 = vld [vmem:[#allocation7 + $0xf8] sm:$0xff]  ;;  %v368_v37 = vld [vmem:[#allocation7 + $0xf0] sm:$0xff]  ;;  %v350_v43 = vld [vmem:[#allocation7 + $0x60] sm:$0xff] }
  0x1d   :  { %370 = vmatpush.msra.mxu2 %v353_v34  ;;  %393 = vmatpush.msra.mxu3 %v369_v35  ;;  %v108_v38 = vld [vmem:[%s742_s2] sm:$0x3]  ;;  %v366_v44 = vld [vmem:[#allocation7 + $0xe0] sm:$0xff]  ;;  %v349_v45 = vld [vmem:[#allocation7 + $0x58] sm:$0xff] }
  0x1e   :  { %121 = vmatpush.msra.mxu0 %v92_v14  ;;  %144 = vmatpush.msra.mxu1 %v93_v15  ;;  %v110_v41 = vperm.slane %v108_v38, 0  ;;  %v111_v42 = vperm.slane %v108_v38, 1  ;;  %v365_v46 = vld [vmem:[#allocation7 + $0xd8] sm:$0xff]  ;;  %v348_v51 = vld [vmem:[#allocation7 + $0x50] sm:$0xff]  ;;  %v347_v55 = vld [vmem:[#allocation7 + $0x48] sm:$0xff] }
  0x1f   :  { %371 = vmatpush.msra.mxu2 %v352_v36  ;;  %394 = vmatpush.msra.mxu3 %v368_v37  ;;  %v364_v52 = vld [vmem:[#allocation7 + $0xd0] sm:$0xff]  ;;  %v363_v56 = vld [vmem:[#allocation7 + $0xc8] sm:$0xff]  ;;  %v346_v59 = vld [vmem:[#allocation7 + $0x40] sm:$0xff] }
  0x20   :  { %122 = vmatpush.msra.mxu0 %v90_v16  ;;  %145 = vmatpush.msra.mxu1 %v91_v17  ;;  %v362_v60 = vld [vmem:[#allocation7 + $0xc0] sm:$0xff]  ;;  %v345_v61 = vld [vmem:[#allocation7 + $0x38] sm:$0xff]  ;;  %v344_v3 = vld [vmem:[#allocation7 + $0x30] sm:$0xff] }
  0x21   :  { %372 = vmatpush.msra.mxu2 %v351_v39  ;;  %395 = vmatpush.msra.mxu3 %v367_v40  ;;  %v361_v62 = vld [vmem:[#allocation7 + $0xb8] sm:$0xff]  ;;  %v360_v4 = vld [vmem:[#allocation7 + $0xb0] sm:$0xff]  ;;  %v343_v9 = vld [vmem:[#allocation7 + $0x28] sm:$0xff] }
  0x22   :  { %123 = vmatpush.msra.mxu0 %v88_v18  ;;  %146 = vmatpush.msra.mxu1 %v89_v19  ;;  %v359_v10 = vld [vmem:[#allocation7 + $0xa8] sm:$0xff]  ;;  %v342_v16 = vld [vmem:[#allocation7 + $0x20] sm:$0xff] }
  0x23   :  { %373 = vmatpush.msra.mxu2 %v350_v43  ;;  %396 = vmatpush.msra.mxu3 %v366_v44  ;;  %v358_v17 = vld [vmem:[#allocation7 + $0xa0] sm:$0xff]  ;;  %v339_v38 = vld [vmem:[#allocation7 + $0x8] sm:$0xff] }
  0x24   :  { %124 = vmatpush.msra.mxu0 %v86_v20  ;;  %147 = vmatpush.msra.mxu1 %v87_v21  ;;  %v355_v39 = vld [vmem:[#allocation7 + $0x88] sm:$0xff] }
  0x25   :  { %374 = vmatpush.msra.mxu2 %v349_v45  ;;  %397 = vmatpush.msra.mxu3 %v365_v46  ;;  %v338_v46 = vld [vmem:[#allocation7] sm:$0xff] }
  0x26   :  { %125 = vmatpush.msra.mxu0 %v84_v22  ;;  %148 = vmatpush.msra.mxu1 %v85_v23 }
  0x27   :  { %375 = vmatpush.msra.mxu2 %v348_v51  ;;  %398 = vmatpush.msra.mxu3 %v364_v52 }
  0x28   :  { %126 = vmatpush.msra.mxu0 %v82_v24  ;;  %149 = vmatpush.msra.mxu1 %v83_v25  ;;  %v341_v24 = vld [vmem:[#allocation7 + $0x18] sm:$0xff] }
  0x29   :  { %376 = vmatpush.msra.mxu2 %v347_v55  ;;  %399 = vmatpush.msra.mxu3 %v363_v56  ;;  %v357_v25 = vld [vmem:[#allocation7 + $0x98] sm:$0xff] }
  0x2a   :  { %127 = vmatpush.msra.mxu0 %v80_v26  ;;  %150 = vmatpush.msra.mxu1 %v81_v27 }
  0x2b   :  { %377 = vmatpush.msra.mxu2 %v346_v59  ;;  %400 = vmatpush.msra.mxu3 %v362_v60 }
  0x2c   :  { %128 = vmatpush.msra.mxu0 %v78_v28  ;;  %151 = vmatpush.msra.mxu1 %v79_v29 }
  0x2d   :  { %378 = vmatpush.msra.mxu2 %v345_v61  ;;  %401 = vmatpush.msra.mxu3 %v361_v62 }
  0x2e   :  { %129 = vmatpush.msra.mxu0 %v76_v30  ;;  %152 = vmatpush.msra.mxu1 %v77_v31 }
  0x2f   :  { %130 = vmatmul.f32.vlgmr.msra.gmra.mxu0 %v74_v32  ;;  %153 = vmatmul.f32.vlgmr.msra.gmra.mxu1 %v74_v32  ;;  %v340_v32 = vld [vmem:[#allocation7 + $0x10] sm:$0xff] }
  0x30   :  { %379 = vmatpush.msra.mxu2 %v344_v3  ;;  %402 = vmatpush.msra.mxu3 %v360_v4 }
  0x32   :  { %380 = vmatpush.msra.mxu2 %v343_v9  ;;  %403 = vmatpush.msra.mxu3 %v359_v10 }
  0x34   :  { %381 = vmatpush.msra.mxu2 %v342_v16  ;;  %404 = vmatpush.msra.mxu3 %v358_v17 }
  0x36   :  { %382 = vmatpush.msra.mxu2 %v341_v24  ;;  %405 = vmatpush.msra.mxu3 %v357_v25 }
  0x37   :  { %133 = vmatmul.f32.gmra.mxu0 %v75_v33  ;;  %156 = vmatmul.f32.gmra.mxu1 %v75_v33  ;;  %v356_v33 = vld [vmem:[#allocation7 + $0x90] sm:$0xff] }
  0x38   :  { %383 = vmatpush.msra.mxu2 %v340_v32  ;;  %406 = vmatpush.msra.mxu3 %v356_v33 }
  0x3a   :  { %384 = vmatpush.msra.mxu2 %v339_v38  ;;  %407 = vmatpush.msra.mxu3 %v355_v39 }
  0x3c   :  { %385 = vmatpush.msra.mxu2 %v338_v46 }
  0xac   :  { %v131_v47 = vpop.f32.mrf.mxu0  ;;  %v154_v48 = vpop.f32.mrf.mxu1 }
  0xad   :  { %v633_v49 = vadd.f32 %v131_v47, %v110_v41  ;;  %v635_v50 = vadd.f32 %v154_v48, %v111_v42  ;;  %v354_v47 = vld [vmem:[#allocation7 + $0x80] sm:$0xff] }
  0xae   :  { %408 = vmatpush.msra.mxu3 %v354_v47 }
  0xaf   :  { %v638_v53 = vmul.f32 0.70710677, %v633_v49  ;;  %v641_v54 = vmul.f32 0.70710677, %v635_v50 }
  0xb1   :  { %v168_v57 = vmul.f32 %v638_v53, %v638_v53  ;;  %v208_v58 = vmul.f32 %v641_v54, %v641_v54 }
  0xb3   :  { %v647_v63 = vmin.f32 %v168_v57, 16.0  ;;  %v649_v0 = vmin.f32 %v208_v58, 16.0 }
  0xb4   :  { %v134_v1 = vpop.f32.mrf.mxu0  ;;  %v157_v2 = vpop.f32.mrf.mxu1 }
  0xb5   :  { %v170_v5 = vmul.f32 2.1237322e-06, %v647_v63  ;;  %v210_v6 = vmul.f32 2.1237322e-06, %v649_v0  ;;  %v653_v7 = vadd.f32 %v134_v1, %v110_v41  ;;  %v655_v8 = vadd.f32 %v157_v2, %v111_v42 }
  0xb6   :  { %v181_v11 = vmul.f32 3.8918573e-05, %v647_v63  ;;  %v221_v21 = vmul.f32 3.8918573e-05, %v649_v0 }
  0xb7   :  { %v171_v12 = vadd.f32 0.00028619796, %v170_v5  ;;  %v211_v13 = vadd.f32 0.00028619796, %v210_v6  ;;  %v659_v14 = vmul.f32 0.70710677, %v653_v7 }
  0xb8   :  { %v662_v15 = vmul.f32 0.70710677, %v655_v8  ;;  %v182_v20 = vadd.f32 0.001143296, %v181_v11  ;;  %v222_v29 = vadd.f32 0.001143296, %v221_v21 }
  0xb9   :  { %v172_v18 = vmul.f32 %v171_v12, %v647_v63  ;;  %v212_v19 = vmul.f32 %v211_v13, %v649_v0  ;;  %v248_v22 = vmul.f32 %v659_v14, %v659_v14 }
  0xba   :  { %v288_v23 = vmul.f32 %v662_v15, %v662_v15  ;;  %v183_v28 = vmul.f32 %v182_v20, %v647_v63  ;;  %v223_v36 = vmul.f32 %v222_v29, %v649_v0 }
  0xbb   :  { %v173_v26 = vadd.f32 0.0036580483, %v172_v18  ;;  %v213_v27 = vadd.f32 0.0036580483, %v212_v19  ;;  %v672_v30 = vmin.f32 %v248_v22, 16.0 }
  0xbc   :  { %v674_v31 = vmin.f32 %v288_v23, 16.0  ;;  %v184_v35 = vadd.f32 0.014752088, %v183_v28  ;;  %v224_v44 = vadd.f32 0.014752088, %v223_v36 }
  0xbd   :  { %v174_v34 = vmul.f32 %v173_v26, %v647_v63  ;;  %v250_v37 = vmul.f32 2.1237322e-06, %v672_v30  ;;  %v261_v40 = vmul.f32 3.8918573e-05, %v672_v30  ;;  %v214_v41 = vmul.f32 %v213_v27, %v649_v0 }
  0xbe   :  { %v290_v42 = vmul.f32 2.1237322e-06, %v674_v31  ;;  %v185_v43 = vmul.f32 %v184_v35, %v647_v63  ;;  %v225_v55 = vmul.f32 %v224_v44, %v649_v0  ;;  %v301_v58 = vmul.f32 3.8918573e-05, %v674_v31 }
  0xbf   :  { %v251_v45 = vadd.f32 0.00028619796, %v250_v37  ;;  %v262_v48 = vadd.f32 0.001143296, %v261_v40  ;;  %v175_v51 = vadd.f32 0.05243302, %v174_v34 }
  0xc0   :  { %v186_v52 = vadd.f32 0.112945676, %v185_v43  ;;  %v215_v59 = vadd.f32 0.05243302, %v214_v41  ;;  %v291_v60 = vadd.f32 0.00028619796, %v290_v42 }
  0xc1   :  { %v252_v56 = vmul.f32 %v251_v45, %v672_v30  ;;  %v263_v57 = vmul.f32 %v262_v48, %v672_v30  ;;  %v226_v62 = vadd.f32 0.112945676, %v225_v55  ;;  %v176_v3 = vmul.f32 %v175_v51, %v647_v63 }
  0xc2   :  { %v187_v61 = vmul.f32 %v186_v52, %v647_v63  ;;  %v302_v9 = vadd.f32 0.001143296, %v301_v58  ;;  %v216_v10 = vmul.f32 %v215_v59, %v649_v0  ;;  %v292_v11 = vmul.f32 %v291_v60, %v674_v31 }
  0xc3   :  { %v253_v1 = vadd.f32 0.0036580483, %v252_v56  ;;  %v264_v2 = vadd.f32 0.014752088, %v263_v57  ;;  %v227_v5 = vmul.f32 %v226_v62, %v649_v0  ;;  %v177_v19 = vadd.f32 0.18741608, %v176_v3 }
  0xc4   :  { %v188_v4 = vadd.f32 0.4994258, %v187_v61  ;;  %v303_v18 = vmul.f32 %v302_v9, %v674_v31  ;;  %v217_v24 = vadd.f32 0.18741608, %v216_v10  ;;  %v293_v25 = vadd.f32 0.0036580483, %v292_v11 }
  0xc5   :  { %v265_v6 = vmul.f32 %v264_v2, %v672_v30  ;;  %v228_v13 = vadd.f32 0.4994258, %v227_v5  ;;  %v254_v16 = vmul.f32 %v253_v1, %v672_v30  ;;  %v178_v29 = vmul.f32 %v177_v19, %v647_v63 }
  0xc6   :  { %v189_v12 = vmul.f32 %v188_v4, %v647_v63  ;;  %v304_v23 = vadd.f32 0.014752088, %v303_v18  ;;  %v218_v33 = vmul.f32 %v217_v24, %v649_v0  ;;  %v294_v34 = vmul.f32 %v293_v25, %v674_v31 }
  0xc7   :  { %v266_v17 = vadd.f32 0.112945676, %v265_v6  ;;  %v229_v21 = vmul.f32 %v228_v13, %v649_v0  ;;  %v255_v26 = vadd.f32 0.05243302, %v254_v16  ;;  %v179_v39 = vadd.f32 1.1283791, %v178_v29 }
  0xc8   :  { %v190_v20 = vadd.f32 1.0, %v189_v12  ;;  %v305_v28 = vmul.f32 %v304_v23, %v674_v31  ;;  %v219_v43 = vadd.f32 1.1283791, %v218_v33  ;;  %v295_v63 = vadd.f32 0.05243302, %v294_v34 }
  0xc9   :  { %v267_v22 = vmul.f32 %v266_v17, %v672_v30  ;;  %v230_v27 = vadd.f32 1.0, %v229_v21  ;;  %v256_v37 = vmul.f32 %v255_v26, %v672_v30  ;;  %v180_v47 = vmul.f32 %v179_v39, %v638_v53 }
  0xca   :  { %467 = vrcp.f32 %v190_v20  ;;  %v306_v36 = vadd.f32 0.112945676, %v305_v28  ;;  %v202_v48 = vand.u32 2147483648, %v190_v20  ;;  %v200_v55 = vand.u32 2147483647, %v190_v20 }
  0xcb   :  { %v268_v32 = vadd.f32 0.4994258, %v267_v22  ;;  %469 = vrcp.f32 %v230_v27  ;;  %v257_v0 = vadd.f32 0.18741608, %v256_v37  ;;  %v220_v57 = vmul.f32 %v219_v43, %v641_v54 }
  0xcc   :  { %v307_v41 = vmul.f32 %v306_v36, %v674_v31  ;;  %v296_v58 = vmul.f32 %v295_v63, %v674_v31  ;;  %vm196_vm1 = vweird.f32 %v190_v20  ;;  %v242_v62 = vand.u32 2147483648, %v230_v27 }
  0xcd   :  { %v269_v35 = vmul.f32 %v268_v32, %v672_v30  ;;  %v258_v60 = vmul.f32 %v257_v0, %v672_v30  ;;  %v203_v2 = vor.u32 1.1754944e-38, %v202_v48  ;;  %v240_v4 = vand.u32 2147483647, %v230_v27 }
  0xce   :  { %v308_v46 = vadd.f32 0.4994258, %v307_v41  ;;  %vm201_vm4 = vcmp.eq.f32.partialorder %v200_v55, 8.507059e+37  ;;  %v297_v6 = vadd.f32 0.18741608, %v296_v58  ;;  %vm236_vm5 = vweird.f32 %v230_v27 }
  0xcf   :  { %v704_v40 = vadd.f32 1.0, %v269_v35  ;;  %v259_v30 = vadd.f32 1.1283791, %v258_v60  ;;  %v243_v12 = vor.u32 1.1754944e-38, %v242_v62  ;;  %vm241_vm7 = vcmp.eq.f32.partialorder %v240_v4, 8.507059e+37 }
  0xd0   :  { %v468_v38 = vpop.eup %467  ;;  %v309_v56 = vmul.f32 %v308_v46, %v674_v31  ;;  %v160_v22 = vmul.f32 0.5, %v633_v49  ;;  %v298_v25 = vmul.f32 %v297_v6, %v674_v31  ;;  %v161_v49 = vmul.f32 0.5, %v635_v50  ;;  %v466_v60 = vld [vmem:[%s744_s4] ss:$0 sm:$0xff] }
  0xd1   :  { %v192_v42 = vmul.f32 %v468_v38, %v190_v20  ;;  %471 = vrcp.f32 %v704_v40  ;;  %v470_v44 = vpop.eup %469  ;;  %vm197_vm0 = vweird.f32 %v468_v38  ;;  %v280_v17 = vand.u32 2147483647, %v704_v40 }
  0xd2   :  { %v232_v51 = vmul.f32 %v470_v44, %v230_v27  ;;  %v713_v1 = vadd.f32 1.0, %v309_v56  ;;  %vm198_vm2 = vmor %vm196_vm1, %vm197_vm0  ;;  %vm237_vm3 = vweird.f32 %v470_v44  ;;  %v282_v18 = vand.u32 2147483648, %v704_v40 }
  0xd3   :  { %v193_v45 = vsub.f32 1.0, %v192_v42  ;;  %vm238_vm6 = vmor %vm236_vm5, %vm237_vm3  ;;  %vm276_vm9 = vweird.f32 %v704_v40  ;;  %v260_v33 = vmul.f32 %v259_v30, %v659_v14  ;;  %vm281_vm11 = vcmp.eq.f32.partialorder %v280_v17, 8.507059e+37 }
  0xd4   :  { %v233_v59 = vsub.f32 1.0, %v232_v51  ;;  %473 = vrcp.f32 %v713_v1  ;;  %v283_v29 = vor.u32 1.1754944e-38, %v282_v18  ;;  %v299_v31 = vadd.f32 1.1283791, %v298_v25 }
  0xd5   :  { %v194_v52 = vmul.f32 %v468_v38, %v193_v45  ;;  %v320_v43 = vand.u32 2147483647, %v713_v1  ;;  %vm316_vm13 = vweird.f32 %v713_v1  ;;  %v162_v50 = vmul.f32 0.5, %v653_v7 }
  0xd6   :  { %v234_v3 = vmul.f32 %v470_v44, %v233_v59  ;;  %v300_v45 = vmul.f32 %v299_v31, %v662_v15  ;;  %v163_v55 = vmul.f32 0.5, %v655_v8 }
  0xd7   :  { %v195_v61 = vadd.f32 %v468_v38, %v194_v52  ;;  %v472_v53 = vpop.eup %471  ;;  %vm321_vm15 = vcmp.eq.f32.partialorder %v320_v43, 8.507059e+37 }
  0xd8   :  { %v272_v54 = vmul.f32 %v472_v53, %v704_v40  ;;  %v235_v10 = vadd.f32 %v470_v44, %v234_v3  ;;  %vm277_vm8 = vweird.f32 %v472_v53  ;;  %v322_v40 = vand.u32 2147483648, %v713_v1 }
  0xd9   :  { %v199_v5 = vsel %vm198_vm2, %v468_v38, %v195_v61  ;;  %vm278_vm10 = vmor %vm276_vm9, %vm277_vm8 }
  0xda   :  { %v204_v9 = vsel %vm201_vm4, %v203_v2, %v199_v5  ;;  %v273_v13 = vsub.f32 1.0, %v272_v54  ;;  %v239_v16 = vsel %vm238_vm6, %v470_v44, %v235_v10  ;;  %v474_v24 = vpop.eup %473  ;;  %v323_v0 = vor.u32 1.1754944e-38, %v322_v40 }
  0xdb   :  { %v205_v11 = vmul.f32 %v204_v9, %v180_v47  ;;  %v244_v20 = vsel %vm241_vm7, %v243_v12, %v239_v16  ;;  %v312_v32 = vmul.f32 %v474_v24, %v713_v1  ;;  %vm317_vm12 = vweird.f32 %v474_v24 }
  0xdc   :  { %v274_v21 = vmul.f32 %v472_v53, %v273_v13  ;;  %v245_v23 = vmul.f32 %v244_v20, %v220_v57  ;;  %vm318_vm14 = vmor %vm316_vm13, %vm317_vm12 }
  0xdd   :  { %v453_v19 = vclamps-f32 %v205_v11, 1.0  ;;  %v313_v38 = vsub.f32 1.0, %v312_v32 }
  0xde   :  { %v275_v27 = vadd.f32 %v472_v53, %v274_v21  ;;  %v454_v28 = vclamps-f32 %v245_v23, 1.0 }
  0xdf   :  { %v328_v26 = vadd.f32 1.0, %v453_v19  ;;  %v314_v42 = vmul.f32 %v474_v24, %v313_v38 }
  0xe0   :  { %v279_v35 = vsel %vm278_vm10, %v472_v53, %v275_v27  ;;  %v329_v36 = vadd.f32 1.0, %v454_v28 }
  0xe1   :  { %v332_v34 = vmul.f32 %v328_v26, %v160_v22  ;;  %v284_v37 = vsel %vm281_vm11, %v283_v29, %v279_v35  ;;  %v315_v14 = vadd.f32 %v474_v24, %v314_v42 }
  0xe2   :  { %v285_v39 = vmul.f32 %v284_v37, %v260_v33  ;;  %v333_v41 = vmul.f32 %v329_v36, %v161_v49 }
  0xe3   :  { %386 = vmatmul.f32.vlgmr.msra.gmra.mxu2 %v332_v34  ;;  %v319_v46 = vsel %vm318_vm14, %v474_v24, %v315_v14 }
  0xe4   :  { %v455_v63 = vclamps-f32 %v285_v39, 1.0  ;;  %409 = vmatmul.f32.vlgmr.msra.gmra.mxu3 %v333_v41  ;;  %v324_v48 = vsel %vm321_vm15, %v323_v0, %v319_v46 }
  0xe5   :  { %v325_v51 = vmul.f32 %v324_v48, %v300_v45 }
  0xe6   :  { %v330_v44 = vadd.f32 1.0, %v455_v63 }
  0xe7   :  { %v456_v52 = vclamps-f32 %v325_v51, 1.0 }
  0xe8   :  { %v334_v47 = vmul.f32 %v330_v44, %v162_v50 }
  0xe9   :  { %v331_v56 = vadd.f32 1.0, %v456_v52 }
  0xeb   :  { %389 = vmatmul.f32.gmra.mxu2 %v334_v47  ;;  %v335_v57 = vmul.f32 %v331_v56, %v163_v55 }
  0xed   :  { %412 = vmatmul.f32.gmra.mxu3 %v335_v57 }
 0x166   :  { %v387_v58 = vpop.f32.mrf.mxu2 }
 0x167   :  { %v410_v59 = vpop.f32.mrf.mxu3 }
 0x168   :  { %v411_v7 = vadd.f32 %v410_v59, %v387_v58 }
 0x16a   :  { %v429_v15 = vadd.f32 %v466_v60, %v411_v7 }
 0x16c   :  { %431 = vst [vmem:[#allocation8] sm:$0xff] %v429_v15 }
 0x16e   :  { %v390_v61 = vpop.f32.mrf.mxu2 }
 0x170   :  { %v413_v62 = vpop.f32.mrf.mxu3 }
 0x171   :  { %v414_v1 = vadd.f32 %v413_v62, %v390_v61 }
 0x173   :  { %v430_v8 = vadd.f32 %v466_v60, %v414_v1 }
 0x175   :  { %432 = vst [vmem:[#allocation8 + $0x8] sm:$0xff] %v430_v8 }
 0x176   :  { %445 = dma.vmem_to_hbm [thread:$0]  %s438_s13, 256, %s440_s16, [#allocation4], %s581_s30, %s581_s30, %s582_s6  }
 0x177   :  { %575 = dma.done.wait [#allocation4], 256  }
 0x178   :  { %576 = vsyncadd [#allocation4], 4294967040 }
 0x179   :  { %450 = vsyncpa [#allocation3], 1 }
 0x17a   :  { %451 = vsyncpa [#allocation6], 1 }
 0x17b   :  { %452 = vsyncpa [#allocation4], 1 }

</bundles_post_ra>
